<compile_context>
chip_gen: v6e
topology: v6e:2x2x1
jax: 0.10.0
libtpu: 0.0.40
codegen_flags: <defaults>
</compile_context>

<pallas_src>
import jax
import jax.numpy as jnp
from jax.experimental import pallas as pl
from jax.experimental.pallas import tpu as pltpu

_LANE = 128
_SUBLANE = 8
_INV_255 = 1.0 / 255.0
# ~4 MiB per output block: >=85% of HBM roofline class tiling on all
# generations; double-buffered in+out stays < 32 MiB scoped VMEM.
_TARGET_BLOCK_BYTES = 4 << 20
# Below this many output bytes, a single grid step is cheaper than splitting
# for megacore: per-step overhead (~0.35 us) outweighs any per-TC DMA win.
_MIN_SPLIT_BYTES = 256 << 10


def _normalize_kernel(x_ref, o_ref):
    # Elementwise: cast (handles uint8 observations) then scale by 1/255 on
    # the VPU.  Note: x * (1/255) differs from x / 255 by <= 1 ULP.
    x = x_ref[...].astype(o_ref.dtype)
    o_ref[...] = x * jnp.asarray(_INV_255, dtype=o_ref.dtype)


def _choose_block_rows(n_rows: int, out_bytes_per_elem: int) -> int:
    """Largest sublane-aligned row count near the target output-block size."""
    target = max(
        _SUBLANE,
        (_TARGET_BLOCK_BYTES // (out_bytes_per_elem * _LANE)) // _SUBLANE * _SUBLANE,
    )
    rows_aligned = -(-n_rows // _SUBLANE) * _SUBLANE
    block_rows = min(target, rows_aligned)
    # v7x has 2 TensorCores: make the ("parallel",) grid have >= 2 steps when
    # the whole input would otherwise fit in one block AND the input is large
    # enough that splitting across cores actually pays for the extra step.
    total_out_bytes = n_rows * _LANE * out_bytes_per_elem
    if (
        block_rows >= n_rows
        and rows_aligned > _SUBLANE
        and total_out_bytes >= _MIN_SPLIT_BYTES
    ):
        half = -(-n_rows // 2)
        block_rows = max(_SUBLANE, -(-half // _SUBLANE) * _SUBLANE)
    return block_rows


def normalize_img(x: jax.Array) -> jax.Array:
    """Pixel normalization x / 255.0 (torch NormalizeImg forward).

    Float inputs keep their dtype; integer inputs (e.g. uint8 observations)
    are promoted to float32, matching torch true-division semantics.
    """
    orig_shape = x.shape
    in_dtype = x.dtype
    out_dtype = in_dtype if jnp.issubdtype(in_dtype, jnp.floating) else jnp.float32
    n_elems = x.size
    if n_elems == 0:
        return jnp.zeros(orig_shape, dtype=out_dtype)

    # Lane-dense 2D view.  A reshape of a contiguous array is layout-free, so
    # the common case (n_elems % 128 == 0) costs no extra HBM pass.
    ragged = (n_elems % _LANE) != 0
    x_flat = jnp.ravel(x)
    if ragged:
        # TODO(synk): rare path (tail not a multiple of 128 lanes) still pads
        # in XLA; could instead mask the last block's store inside the kernel.
        pad = _LANE - (n_elems % _LANE)
        x_flat = jnp.concatenate([x_flat, jnp.zeros((pad,), dtype=in_dtype)])
    n_rows = x_flat.size // _LANE
    x2d = x_flat.reshape(n_rows, _LANE)

    out_bytes_per_elem = jnp.dtype(out_dtype).itemsize
    block_rows = _choose_block_rows(n_rows, out_bytes_per_elem)
    grid = (pl.cdiv(n_rows, block_rows),)

    out2d = pl.pallas_call(
        _normalize_kernel,
        out_shape=jax.ShapeDtypeStruct((n_rows, _LANE), out_dtype),
        grid_spec=pltpu.PrefetchScalarGridSpec(
            num_scalar_prefetch=0,
            grid=grid,
            in_specs=[pl.BlockSpec((block_rows, _LANE), lambda i: (i, 0))],
            out_specs=pl.BlockSpec((block_rows, _LANE), lambda i: (i, 0)),
        ),
        compiler_params=pltpu.CompilerParams(
            dimension_semantics=("parallel",),
        ),
    )(x2d)

    if ragged:
        return out2d.reshape(-1)[:n_elems].reshape(orig_shape)
    return out2d.reshape(orig_shape)


if __name__ == "__main__":
    key = jax.random.PRNGKey(0)
    k_f, k_u, k_r = jax.random.split(key, 3)

    # Float pixel observations: N=2, C=4, H=16, W=16 (NCHW).
    x_f32 = jax.random.uniform(
        k_f, (2, 4, 16, 16), dtype=jnp.float32, minval=0.0, maxval=255.0
    )
    y_f32 = jax.block_until_ready(normalize_img(x_f32))
    ref_f32 = x_f32 / 255.0
    assert y_f32.shape == x_f32.shape and y_f32.dtype == x_f32.dtype
    assert jnp.max(jnp.abs(y_f32 - ref_f32)) < 1e-6

    # uint8 pixel observations (typical obs dtype): promoted to float32.
    x_u8 = jax.random.randint(k_u, (2, 4, 16, 16), 0, 256, dtype=jnp.int32).astype(
        jnp.uint8
    )
    y_u8 = jax.block_until_ready(normalize_img(x_u8))
    ref_u8 = x_u8.astype(jnp.float32) / 255.0
    assert y_u8.shape == x_u8.shape and y_u8.dtype == jnp.float32
    assert jnp.max(jnp.abs(y_u8 - ref_u8)) < 1e-6

    # Ragged size (not a multiple of 128 lanes) exercises the padded path.
    x_rag = jax.random.uniform(
        k_r, (3, 5, 7), dtype=jnp.float32, minval=0.0, maxval=255.0
    )
    y_rag = jax.block_until_ready(normalize_img(x_rag))
    ref_rag = x_rag / 255.0
    assert y_rag.shape == x_rag.shape and y_rag.dtype == x_rag.dtype
    assert jnp.max(jnp.abs(y_rag - ref_rag)) < 1e-6

    print("KERNEL_OK")
</pallas_src>

<mosaic_0001>
module attributes {stable_mosaic.version = 11 : i64} {
  func.func @_normalize_kernel(%arg0: i32, %arg1: memref<16x128xf32, #tpu.memory_space<vmem>>, %arg2: memref<16x128xf32, #tpu.memory_space<vmem>>) attributes {dimension_semantics = [#tpu.dimension_semantics<parallel>], iteration_bounds = array<i64: 1>, scalar_prefetch = 0 : i64, scratch_operands = 0 : i64, tpu.core_type = #tpu.core_type<tc>, window_params = [{transform_indices = @transform_0, window_bounds = array<i64: 16, 128>}, {transform_indices = @transform_1, window_bounds = array<i64: 16, 128>}]} {
    %c0 = arith.constant 0 : index
    %c0_0 = arith.constant 0 : index
    %0 = vector.load %arg1[%c0, %c0_0] : memref<16x128xf32, #tpu.memory_space<vmem>>, vector<16x128xf32>
    %cst = arith.constant 0.00392156886 : f32
    %1 = vector.broadcast %cst : f32 to vector<16x128xf32>
    %2 = arith.mulf %0, %1 : vector<16x128xf32>
    %c0_1 = arith.constant 0 : index
    %c0_2 = arith.constant 0 : index
    %3 = vector.load %arg2[%c0_1, %c0_2] : memref<16x128xf32, #tpu.memory_space<vmem>>, vector<16x128xf32>
    tpu.vector_store %arg2[%c0_1, %c0_2], %2 {strides = array<i32>} : memref<16x128xf32, #tpu.memory_space<vmem>>, vector<16x128xf32>,
    return
  }
  func.func @transform_0(%arg0: i32) -> (i32, i32) {
    %c0_i32 = arith.constant 0 : i32
    %c0_i32_0 = arith.constant 0 : i32
    return %arg0, %c0_i32 : i32, i32
  }
  func.func @transform_1(%arg0: i32) -> (i32, i32) {
    %c0_i32 = arith.constant 0 : i32
    %c0_i32_0 = arith.constant 0 : i32
    return %arg0, %c0_i32 : i32, i32
  }
}

</mosaic_0001>

<bundles_post_ra>
// kernel: tpu_custom_call.1
= control target key start
LH: loop header
LB: loop body
LE: loop exit
PB: predicated region body
PF: predicated region fallthrough
CT: control target
= control target key end

     0   :  { %6 = vsyncpa [#allocation3], 0  ;;  %s114_s0 = inlined_call_operand.hbm [shape: f32[16,128], index: 0, kind: input, shape index: {}]   ;;  %s115_s1 = inlined_call_operand.hbm [shape: f32[16,128], index: 1, kind: output, shape index: {}]  }
   0x1   :  { %7 = vsyncpa [#allocation4], 0  ;;  %s94_s6 = smov [#allocation2]  }
   0x2   :  { %s13_s7 = sshll.u32 %s94_s6, 4  ;;  %s14_s7 = int_to_ptr.vmem [resolvable:$true] %s13_s7 }
   0x3   :  { %s58_s8 = scalar_lea.vmem %s14_s7, 256  ;;  %p63_p1 = scmp.lt.s32.totalorder %s14_s7, %s14_s7 }
   0x4   :  { %p59_p0 = scmp.ne.s32.totalorder %s14_s7, %s58_s8  ;;  %p64_p2 = scmp.lt.s32.totalorder %s58_s8, %s58_s8 }
   0x6   :  { %p65_p3 = por %p64_p2, %p63_p1 }
   0x8   :  { %p66_p4 = pnand %p65_p3, %p59_p0 }
   0xa   :  { %69 = shalt.err (!%p66_p4)
}
   0xb   :  { %s95_s9 = smov 128   ;;  %s96_s10 = smov 8  }
   0xc   :  { %19 = dma.hbm_to_vmem [thread:$0]  %s114_s0, 256, %s14_s7, [#allocation3], %s95_s9, %s95_s9, %s96_s10  }
   0xd   :  { %90 = dma.done.wait [#allocation3], 256  }
   0xe   :  { %91 = vsyncadd [#allocation3], 4294967040  ;;  %s97_s13 = smov [#allocation5]   ;;  %v23_v0 = vld [vmem:[#allocation2] sm:$0xff]  ;;  %v24_v1 = vld [vmem:[#allocation2 + $0x8] sm:$0xff] }
   0xf   :  { %s34_s14 = sshll.u32 %s97_s13, 4  ;;  %v25_v2 = vmul.f32 0.003921569, %v23_v0  ;;  %v26_v3 = vmul.f32 0.003921569, %v24_v1  ;;  %s35_s14 = int_to_ptr.vmem [resolvable:$true] %s34_s14 }
  0x10   :  { %s70_s15 = scalar_lea.vmem %s35_s14, 256  ;;  %p75_p6 = scmp.lt.s32.totalorder %s35_s14, %s35_s14 }
  0x11   :  { %27 = vst [vmem:[#allocation5] sm:$0xff] %v25_v2  ;;  %28 = vst [vmem:[#allocation5 + $0x8] sm:$0xff] %v26_v3  ;;  %p71_p5 = scmp.ne.s32.totalorder %s35_s14, %s70_s15  ;;  %p76_p7 = scmp.lt.s32.totalorder %s70_s15, %s70_s15 }
  0x13   :  { %p77_p8 = por %p76_p7, %p75_p6 }
  0x15   :  { %p78_p9 = pnand %p77_p8, %p71_p5 }
  0x17   :  { %81 = shalt.err (!%p78_p9)
}
  0x18   :  { %40 = dma.vmem_to_hbm [thread:$0]  %s35_s14, 256, %s115_s1, [#allocation4], %s95_s9, %s95_s9, %s96_s10  }
  0x19   :  { %92 = dma.done.wait [#allocation4], 256  }
  0x1a   :  { %93 = vsyncadd [#allocation4], 4294967040 }
  0x1b   :  { %44 = vsyncpa [#allocation3], 1 }
  0x1c   :  { %45 = vsyncpa [#allocation4], 1 }

</bundles_post_ra>
